<compile_context>
chip_gen: v7x
topology: tpu7x:2x2x1
jax: 0.10.0
libtpu: 0.0.40
codegen_flags: <defaults>
</compile_context>

<pallas_src>
import jax
import jax.numpy as jnp
from jax.experimental import pallas as pl
from jax.experimental.pallas import tpu as pltpu


# ---------------------------------------------------------------------------- kernels


def _ffn_kernel_resident(x_ref, w1_ref, b1_ref, w2_ref, b2_ref, o_ref):
    """Single reduction chunk (weights fully VMEM-resident): no accumulator scratch."""
    # x_ref: (tm, d)  w1_ref: (d, f)  b1_ref: (1, f)  w2_ref: (f, d)  b2_ref: (1, d)
    h = jnp.dot(x_ref[...], w1_ref[...], preferred_element_type=jnp.float32)
    h = jnp.maximum(h + b1_ref[...], 0.0)          # linear1 + bias + ReLU
    # dropout1: identity (eval mode)
    out = jnp.dot(h.astype(w2_ref.dtype), w2_ref[...],
                  preferred_element_type=jnp.float32)
    # dropout2: identity (eval mode)
    o_ref[...] = (out + b2_ref[...]).astype(o_ref.dtype)


def _ffn_kernel_streamed(x_ref, w1_ref, b1_ref, w2_ref, b2_ref, o_ref, acc_ref):
    """dim_ff streamed in tk chunks; f32 accumulator in VMEM scratch."""
    # x_ref: (tm, d)  w1_ref: (d, tk)  b1_ref: (1, tk)  w2_ref: (tk, d)  b2_ref: (1, d)
    k = pl.program_id(1)

    @pl.when(k == 0)
    def _():
        acc_ref[...] = jnp.zeros_like(acc_ref)

    h = jnp.dot(x_ref[...], w1_ref[...], preferred_element_type=jnp.float32)
    h = jnp.maximum(h + b1_ref[...], 0.0)          # linear1 chunk + bias + ReLU
    # dropout1: identity (eval mode)
    acc_ref[...] += jnp.dot(h.astype(w2_ref.dtype), w2_ref[...],
                            preferred_element_type=jnp.float32)

    @pl.when(k == pl.num_programs(1) - 1)
    def _():
        # bias2 added exactly once; dropout2: identity (eval mode)
        o_ref[...] = (acc_ref[...] + b2_ref[...]).astype(o_ref.dtype)


# ---------------------------------------------------------------------------- helpers


def _round_up(x, m):
    return ((x + m - 1) // m) * m


def _vmem_capacity_bytes():
    try:
        return int(pltpu.get_tpu_info().vmem_capacity_bytes)
    except Exception:
        return 64 * 1024 * 1024      # conservative: v7x per-TC VMEM


def _pick_tk(dim_ff, tk_pref):
    """Pick a reduction-chunk width: a divisor of dim_ff, multiple of 256 (MXU width on
    v6e/v7x; 128 fallback), no larger than tk_pref.  Never silently requests a
    full-width block for awkward dim_ff unless nothing aligned divides it."""
    tk_pref = max(int(tk_pref), 128)
    if dim_ff <= tk_pref:
        return dim_ff
    if dim_ff % tk_pref == 0:
        return tk_pref
    for align in (256, 128):
        best = 0
        cand = align
        while cand <= tk_pref:
            if dim_ff % cand == 0:
                best = cand
            cand += align
        if best:
            return best
    return dim_ff   # dim_ff not a multiple of 128: fall back to a single chunk


# ---------------------------------------------------------------------------- wrapper


def feedforward(x, w1, b1, w2, b2, *, tm=None, tk=512, matmul_dtype=None,
                weights_resident=None):
    """x: (batch, seq, dim_model) -> (batch, seq, dim_model).

    w1: (dim_model, dim_ff), b1: (dim_ff,), w2: (dim_ff, dim_model), b2: (dim_model,).
    matmul_dtype: MXU input dtype.  Default: bfloat16 when x is float32 (f32 accumulate,
                  f32 biases, output keeps x.dtype); pass jnp.float32 to force f32 MXU.
    weights_resident: None = auto (resident when W1+W2 fit VMEM); True/False to force.
    """
    batch, seq, dim_model = x.shape
    dim_ff = w1.shape[1]
    out_dtype = x.dtype
    rows = batch * seq

    # MXU input dtype: default to bf16 for f32 callers.
    if matmul_dtype is not None:
        mdt = jnp.dtype(matmul_dtype)
    elif jnp.dtype(x.dtype) == jnp.dtype(jnp.float32):
        mdt = jnp.dtype(jnp.bfloat16)
    else:
        mdt = jnp.dtype(x.dtype)
    isz = mdt.itemsize
    osz = jnp.dtype(out_dtype).itemsize

    vmem_cap = _vmem_capacity_bytes()
    budget = int(0.70 * vmem_cap)    # headroom for Mosaic internal scratch

    # ---- VMEM footprint models (double-buffered pipeline tiles + intermediates) ----
    def resident_bytes(tm_):
        w = 2 * 2 * dim_model * dim_ff * isz          # W1+W2, 2 pipeline buffers each
        xo = 2 * tm_ * dim_model * (isz + osz)        # x / out tiles
        h = tm_ * dim_ff * (4 + isz)                  # f32 h + bf16 cast copy
        b = 2 * (dim_ff + dim_model) * 4
        return w + xo + h + b

    def streamed_bytes(tm_, tk_):
        w = 2 * 2 * dim_model * tk_ * isz             # W1/W2 chunks, double-buffered
        xo = 2 * tm_ * dim_model * (isz + osz)
        h = tm_ * tk_ * (4 + isz)
        acc = tm_ * dim_model * 4
        b = 2 * (tk_ + dim_model) * 4
        return w + xo + h + acc + b

    # ---- choose reduction chunk (residency) ----
    tk_eff = min(int(tk), dim_ff)
    if dim_ff % tk_eff != 0:
        tk_eff = _pick_tk(dim_ff, tk_eff)

    probe_tm = min(256, _round_up(rows, 8))
    if weights_resident is True:
        tk_eff = dim_ff
    elif weights_resident is None and resident_bytes(probe_tm) <= budget:
        tk_eff = dim_ff                               # weights fit: DMA them once

    # ---- choose row tile ----
    if tm is None:
        tm_eff = 256 if tk_eff == dim_ff else 512     # streaming needs tall tiles (AI)
    else:
        tm_eff = int(tm)
    tm_eff = max(8, min(_round_up(tm_eff, 8), _round_up(rows, 8)))

    # ---- make sure the chosen config fits: shrink tk first, then tm ----
    if tk_eff == dim_ff:
        while tm_eff > 8 and resident_bytes(tm_eff) > budget:
            tm_eff = max(8, _round_up(tm_eff // 2, 8))
    else:
        while (streamed_bytes(tm_eff, tk_eff) > budget and tk_eff >= 256
               and tk_eff % 2 == 0 and (tk_eff // 2) % 128 == 0
               and dim_ff % (tk_eff // 2) == 0):
            tk_eff //= 2
        while tm_eff > 8 and streamed_bytes(tm_eff, tk_eff) > budget:
            tm_eff = max(8, _round_up(tm_eff // 2, 8))

    n_row_tiles = pl.cdiv(rows, tm_eff)
    n_k = dim_ff // tk_eff

    # ---- operands (no wrapper-side padding of x; partial last row tile is masked) ----
    x2d = x.reshape(rows, dim_model).astype(mdt)
    w1c = w1.astype(mdt)
    w2c = w2.astype(mdt)
    b1_2d = b1.reshape(1, dim_ff).astype(jnp.float32)
    b2_2d = b2.reshape(1, dim_model).astype(jnp.float32)

    est = resident_bytes(tm_eff) if n_k == 1 else streamed_bytes(tm_eff, tk_eff)
    vmem_limit = int(min(max(int(1.25 * est), 32 << 20),
                         max(vmem_cap - (8 << 20), 32 << 20)))

    if n_k == 1:
        # Weights-resident path: constant weight index_maps -> single weight DMA,
        # no accumulator scratch, output written directly.
        out2d = pl.pallas_call(
            _ffn_kernel_resident,
            out_shape=jax.ShapeDtypeStruct((rows, dim_model), out_dtype),
            grid_spec=pltpu.PrefetchScalarGridSpec(
                num_scalar_prefetch=0,
                grid=(n_row_tiles,),
                in_specs=[
                    pl.BlockSpec((tm_eff, dim_model), lambda i: (i, 0)),   # x tile
                    pl.BlockSpec((dim_model, dim_ff), lambda i: (0, 0)),   # W1 (resident)
                    pl.BlockSpec((1, dim_ff),         lambda i: (0, 0)),   # b1
                    pl.BlockSpec((dim_ff, dim_model), lambda i: (0, 0)),   # W2 (resident)
                    pl.BlockSpec((1, dim_model),      lambda i: (0, 0)),   # b2
                ],
                out_specs=pl.BlockSpec((tm_eff, dim_model), lambda i: (i, 0)),
            ),
            compiler_params=pltpu.CompilerParams(
                dimension_semantics=("parallel",),
                vmem_limit_bytes=vmem_limit,
            ),
        )(x2d, w1c, b1_2d, w2c, b2_2d)
    else:
        # Streaming path: dim_ff chunked (reduction axis last), f32 accumulator.
        out2d = pl.pallas_call(
            _ffn_kernel_streamed,
            out_shape=jax.ShapeDtypeStruct((rows, dim_model), out_dtype),
            grid_spec=pltpu.PrefetchScalarGridSpec(
                num_scalar_prefetch=0,
                grid=(n_row_tiles, n_k),
                in_specs=[
                    pl.BlockSpec((tm_eff, dim_model), lambda i, k: (i, 0)),  # x tile
                    pl.BlockSpec((dim_model, tk_eff), lambda i, k: (0, k)),  # W1 chunk
                    pl.BlockSpec((1, tk_eff),         lambda i, k: (0, k)),  # b1 chunk
                    pl.BlockSpec((tk_eff, dim_model), lambda i, k: (k, 0)),  # W2 chunk
                    pl.BlockSpec((1, dim_model),      lambda i, k: (0, 0)),  # b2
                ],
                out_specs=pl.BlockSpec((tm_eff, dim_model), lambda i, k: (i, 0)),
                scratch_shapes=[pltpu.VMEM((tm_eff, dim_model), jnp.float32)],
            ),
            compiler_params=pltpu.CompilerParams(
                dimension_semantics=("parallel", "arbitrary"),
                vmem_limit_bytes=vmem_limit,
            ),
        )(x2d, w1c, b1_2d, w2c, b2_2d)

    return out2d.reshape(batch, seq, dim_model)


# ---------------------------------------------------------------------------- testing


def _reference(x, w1, b1, w2, b2):
    h = jnp.maximum(
        jnp.einsum("bsd,df->bsf", x, w1, precision=jax.lax.Precision.HIGHEST) + b1, 0.0)
    return jnp.einsum("bsf,fd->bsd", h, w2, precision=jax.lax.Precision.HIGHEST) + b2


if __name__ == "__main__":
    # Shapes consistent with the module: dim_model=128, dim_feedforward=4*dim_model.
    batch, seq, dim_model = 2, 8, 128
    dim_ff = 4 * dim_model

    key = jax.random.PRNGKey(0)
    kx, k1, k2, k3, k4 = jax.random.split(key, 5)

    x = jax.random.normal(kx, (batch, seq, dim_model), dtype=jnp.float32)
    w1 = jax.random.normal(k1, (dim_model, dim_ff), dtype=jnp.float32) * 0.02
    b1 = jax.random.normal(k2, (dim_ff,), dtype=jnp.float32) * 0.02
    w2 = jax.random.normal(k3, (dim_ff, dim_model), dtype=jnp.float32) * 0.02
    b2 = jax.random.normal(k4, (dim_model,), dtype=jnp.float32) * 0.02

    ref = _reference(x, w1, b1, w2, b2)

    # 1) Default path: bf16 MXU inputs (f32 accumulation), weights-resident fast path.
    out = jax.block_until_ready(feedforward(x, w1, b1, w2, b2))
    assert out.shape == (batch, seq, dim_model) and out.dtype == x.dtype
    assert jnp.allclose(out, ref, atol=5e-2, rtol=5e-2), "mismatch (default bf16)"

    # 2) Forced f32 MXU path (tight tolerance), still weights-resident.
    out_f32 = jax.block_until_ready(
        feedforward(x, w1, b1, w2, b2, matmul_dtype=jnp.float32))
    assert jnp.allclose(out_f32, ref, atol=2e-3, rtol=2e-3), "mismatch (f32 resident)"

    # 3) Streaming path: multi row-tile grid + chunked dim_ff reduction with accumulator.
    out_stream = jax.block_until_ready(
        feedforward(x, w1, b1, w2, b2, tm=8, tk=128,
                    matmul_dtype=jnp.float32, weights_resident=False))
    assert jnp.allclose(out_stream, ref, atol=2e-3, rtol=2e-3), "mismatch (streamed)"

    # 4) Non-divisible row count: last row tile runs partially out of bounds (no pad).
    x_odd = x[:, :5, :]
    ref_odd = _reference(x_odd, w1, b1, w2, b2)
    out_odd = jax.block_until_ready(
        feedforward(x_odd, w1, b1, w2, b2, matmul_dtype=jnp.float32))
    assert jnp.allclose(out_odd, ref_odd, atol=2e-3, rtol=2e-3), "mismatch (partial tile)"

    print("KERNEL_OK")
</pallas_src>

<mosaic_0001>
module attributes {stable_mosaic.version = 11 : i64} {
  func.func @_ffn_kernel_resident(%arg0: i32, %arg1: memref<16x128xbf16, #tpu.memory_space<vmem>>, %arg2: memref<128x512xbf16, #tpu.memory_space<vmem>>, %arg3: memref<1x512xf32, #tpu.memory_space<vmem>>, %arg4: memref<512x128xbf16, #tpu.memory_space<vmem>>, %arg5: memref<1x128xf32, #tpu.memory_space<vmem>>, %arg6: memref<16x128xf32, #tpu.memory_space<vmem>>) attributes {dimension_semantics = [#tpu.dimension_semantics<parallel>], iteration_bounds = array<i64: 1>, scalar_prefetch = 0 : i64, scratch_operands = 0 : i64, tpu.core_type = #tpu.core_type<tc>, window_params = [{transform_indices = @transform_0, window_bounds = array<i64: 16, 128>}, {pipeline_mode = #tpu.pipeline_mode<synchronous>, transform_indices = @transform_1, window_bounds = array<i64: 128, 512>}, {pipeline_mode = #tpu.pipeline_mode<synchronous>, transform_indices = @transform_2, window_bounds = array<i64: 1, 512>}, {pipeline_mode = #tpu.pipeline_mode<synchronous>, transform_indices = @transform_3, window_bounds = array<i64: 512, 128>}, {pipeline_mode = #tpu.pipeline_mode<synchronous>, transform_indices = @transform_4, window_bounds = array<i64: 1, 128>}, {transform_indices = @transform_5, window_bounds = array<i64: 16, 128>}]} {
    %c0 = arith.constant 0 : index
    %c0_0 = arith.constant 0 : index
    %0 = vector.load %arg1[%c0, %c0_0] : memref<16x128xbf16, #tpu.memory_space<vmem>>, vector<16x128xbf16>
    %c0_1 = arith.constant 0 : index
    %c0_2 = arith.constant 0 : index
    %1 = vector.load %arg2[%c0_1, %c0_2] : memref<128x512xbf16, #tpu.memory_space<vmem>>, vector<128x512xbf16>
    %cst = arith.constant dense<0.000000e+00> : vector<16x512xf32>
    %2 = tpu.matmul %0, %1, %cst {dimension_numbers = #tpu.dot_dimension_numbers<[1], [0], [0], [1], [0, 0, 1, 1], [], []>} : vector<16x128xbf16>, vector<128x512xbf16>, vector<16x512xf32> -> vector<16x512xf32>
    %c0_3 = arith.constant 0 : index
    %c0_4 = arith.constant 0 : index
    %3 = vector.load %arg3[%c0_3, %c0_4] : memref<1x512xf32, #tpu.memory_space<vmem>>, vector<1x512xf32>
    %4 = vector.broadcast %3 : vector<1x512xf32> to vector<16x512xf32>
    %5 = arith.addf %2, %4 : vector<16x512xf32>
    %cst_5 = arith.constant 0.000000e+00 : f32
    %6 = vector.broadcast %cst_5 : f32 to vector<16x512xf32>
    %7 = arith.maximumf %5, %6 : vector<16x512xf32>
    %8 = arith.truncf %7 : vector<16x512xf32> to vector<16x512xbf16>
    %c0_6 = arith.constant 0 : index
    %c0_7 = arith.constant 0 : index
    %9 = vector.load %arg4[%c0_6, %c0_7] : memref<512x128xbf16, #tpu.memory_space<vmem>>, vector<512x128xbf16>
    %cst_8 = arith.constant dense<0.000000e+00> : vector<16x128xf32>
    %10 = tpu.matmul %8, %9, %cst_8 {dimension_numbers = #tpu.dot_dimension_numbers<[1], [0], [0], [1], [0, 0, 1, 1], [], []>} : vector<16x512xbf16>, vector<512x128xbf16>, vector<16x128xf32> -> vector<16x128xf32>
    %c0_9 = arith.constant 0 : index
    %c0_10 = arith.constant 0 : index
    %11 = vector.load %arg5[%c0_9, %c0_10] : memref<1x128xf32, #tpu.memory_space<vmem>>, vector<1x128xf32>
    %12 = vector.broadcast %11 : vector<1x128xf32> to vector<16x128xf32>
    %13 = arith.addf %10, %12 : vector<16x128xf32>
    %c0_11 = arith.constant 0 : index
    %c0_12 = arith.constant 0 : index
    %14 = vector.load %arg6[%c0_11, %c0_12] : memref<16x128xf32, #tpu.memory_space<vmem>>, vector<16x128xf32>
    tpu.vector_store %arg6[%c0_11, %c0_12], %13 {strides = array<i32>} : memref<16x128xf32, #tpu.memory_space<vmem>>, vector<16x128xf32>,
    return
  }
  func.func @transform_0(%arg0: i32) -> (i32, i32) {
    %c0_i32 = arith.constant 0 : i32
    %c0_i32_0 = arith.constant 0 : i32
    return %arg0, %c0_i32 : i32, i32
  }
  func.func @transform_1(%arg0: i32) -> (i32, i32) {
    %c0_i32 = arith.constant 0 : i32
    %c0_i32_0 = arith.constant 0 : i32
    %c0_i32_1 = arith.constant 0 : i32
    return %c0_i32, %c0_i32_0 : i32, i32
  }
  func.func @transform_2(%arg0: i32) -> (i32, i32) {
    %c0_i32 = arith.constant 0 : i32
    %c0_i32_0 = arith.constant 0 : i32
    %c0_i32_1 = arith.constant 0 : i32
    return %c0_i32, %c0_i32_0 : i32, i32
  }
  func.func @transform_3(%arg0: i32) -> (i32, i32) {
    %c0_i32 = arith.constant 0 : i32
    %c0_i32_0 = arith.constant 0 : i32
    %c0_i32_1 = arith.constant 0 : i32
    return %c0_i32, %c0_i32_0 : i32, i32
  }
  func.func @transform_4(%arg0: i32) -> (i32, i32) {
    %c0_i32 = arith.constant 0 : i32
    %c0_i32_0 = arith.constant 0 : i32
    %c0_i32_1 = arith.constant 0 : i32
    return %c0_i32, %c0_i32_0 : i32, i32
  }
  func.func @transform_5(%arg0: i32) -> (i32, i32) {
    %c0_i32 = arith.constant 0 : i32
    %c0_i32_0 = arith.constant 0 : i32
    return %arg0, %c0_i32 : i32, i32
  }
}

</mosaic_0001>

<bundles_post_ra>
// kernel: tpu_custom_call.1
= control target key start
LH: loop header
LB: loop body
LE: loop exit
PB: predicated region body
PF: predicated region fallthrough
CT: control target
= control target key end

     0   :  { %10 = vsyncpa [#allocation3], 0  ;;  %s1139_s0 = inlined_call_operand.hbm [shape: bf16[16,128], index: 0, kind: input, shape index: {}]   ;;  %s1140_s1 = inlined_call_operand.hbm [shape: bf16[128,512], index: 1, kind: input, shape index: {}]   ;;  %s1141_s2 = inlined_call_operand.vmem [shape: f32[1,512], index: 2, kind: input, shape index: {}]   ;;  %s1142_s3 = inlined_call_operand.hbm [shape: bf16[512,128], index: 3, kind: input, shape index: {}]   ;;  %s1143_s4 = inlined_call_operand.vmem [shape: f32[1,128], index: 4, kind: input, shape index: {}]   ;;  %s1144_s5 = inlined_call_operand.hbm [shape: f32[16,128], index: 5, kind: output, shape index: {}]  }
   0x1   :  { %11 = vsyncpa [#allocation6], 0 }
   0x2   :  { %12 = vsyncpa [#allocation4], 0  ;;  %s1044_s18 = smov [#allocation5]   ;;  %s950_s22 = scalar_lea.hbm %s1140_s1, 4096 }
   0x3   :  { %s30_s19 = sshll.u32 %s1044_s18, 4  ;;  %p951_p0 = scmp.ne.s32.totalorder %s1140_s1, %s950_s22  ;;  %s31_s19 = int_to_ptr.vmem [resolvable:$true] %s30_s19 }
   0x4   :  { %p954_p1 = scmp.lt.u32.totalorder %s950_s22, %s1140_s1 }
   0x6   :  { %p956_p2 = pnand %p954_p1, %p951_p0 }
   0x8   :  { %959 = shalt.err (!%p956_p2)
}
   0x9   :  { %s960_s27 = scalar_lea.vmem %s31_s19, 4096  ;;  %p965_p4 = scmp.lt.s32.totalorder %s31_s19, %s31_s19 }
   0xa   :  { %p961_p3 = scmp.ne.s32.totalorder %s31_s19, %s960_s27  ;;  %p966_p5 = scmp.lt.s32.totalorder %s960_s27, %s960_s27 }
   0xc   :  { %p967_p6 = por %p966_p5, %p965_p4 }
   0xe   :  { %p968_p7 = pnand %p967_p6, %p961_p3 }
  0x10   :  { %971 = shalt.err (!%p968_p7)
}
  0x11   :  { %s1045_s28 = smov 256   ;;  %s1046_s29 = smov 16  }
  0x12   :  { %36 = dma.hbm_to_vmem [thread:$0]  %s1140_s1, 4096, %s31_s19, [#allocation6], %s1045_s28, %s1045_s28, %s1046_s29  }
  0x13   :  { %s1047_s7 = smov [#allocation2]   ;;  %s972_s11 = scalar_lea.hbm %s1139_s0, 128 }
  0x14   :  { %s18_s8 = sshll.u32 %s1047_s7, 4  ;;  %p973_p8 = scmp.ne.s32.totalorder %s1139_s0, %s972_s11  ;;  %s19_s8 = int_to_ptr.vmem [resolvable:$true] %s18_s8 }
  0x15   :  { %p976_p9 = scmp.lt.u32.totalorder %s972_s11, %s1139_s0 }
  0x17   :  { %p978_p10 = pnand %p976_p9, %p973_p8 }
  0x19   :  { %981 = shalt.err (!%p978_p10)
}
  0x1a   :  { %s982_s16 = scalar_lea.vmem %s19_s8, 128  ;;  %p987_p12 = scmp.lt.s32.totalorder %s19_s8, %s19_s8 }
  0x1b   :  { %p983_p11 = scmp.ne.s32.totalorder %s19_s8, %s982_s16  ;;  %p988_p13 = scmp.lt.s32.totalorder %s982_s16, %s982_s16 }
  0x1d   :  { %p989_p0 = por %p988_p13, %p987_p12 }
  0x1f   :  { %p990_p1 = pnand %p989_p0, %p983_p11 }
  0x21   :  { %993 = shalt.err (!%p990_p1)
}
  0x22   :  { %s1048_s1 = smov 64   ;;  %s1049_s17 = smov 4  }
  0x23   :  { %24 = dma.hbm_to_vmem [thread:$0]  %s1139_s0, 128, %s19_s8, [#allocation3], %s1048_s1, %s1048_s1, %s1049_s17  }
  0x24   :  { %s1050_s20 = smov [#allocation7]   ;;  %s994_s24 = scalar_lea.hbm %s1142_s3, 4096 }
  0x25   :  { %s44_s21 = sshll.u32 %s1050_s20, 4  ;;  %p995_p2 = scmp.ne.s32.totalorder %s1142_s3, %s994_s24  ;;  %s45_s21 = int_to_ptr.vmem [resolvable:$true] %s44_s21 }
  0x26   :  { %p998_p3 = scmp.lt.u32.totalorder %s994_s24, %s1142_s3 }
  0x28   :  { %p1000_p4 = pnand %p998_p3, %p995_p2 }
  0x2a   :  { %1003 = shalt.err (!%p1000_p4)
}
  0x2b   :  { %s1004_s29 = scalar_lea.vmem %s45_s21, 4096  ;;  %p1009_p6 = scmp.lt.s32.totalorder %s45_s21, %s45_s21 }
  0x2c   :  { %p1005_p5 = scmp.ne.s32.totalorder %s45_s21, %s1004_s29  ;;  %p1010_p7 = scmp.lt.s32.totalorder %s1004_s29, %s1004_s29 }
  0x2e   :  { %p1011_p8 = por %p1010_p7, %p1009_p6 }
  0x30   :  { %p1012_p9 = pnand %p1011_p8, %p1005_p5 }
  0x32   :  { %1015 = shalt.err (!%p1012_p9)
}
  0x33   :  { %50 = dma.hbm_to_vmem [thread:$0]  %s1142_s3, 4096, %s45_s21, [#allocation6], %s1048_s1, %s1048_s1, %s1049_s17  }
  0x34   :  { %1038 = dma.done.wait [#allocation3], 128  }
  0x35   :  { %1039 = vsyncadd [#allocation3], 4294967168 }
  0x36   :  { %1040 = dma.done.wait [#allocation6], 8192  }
  0x37   :  { %1041 = vsyncadd [#allocation6], 4294959104  ;;  %v1051_v0 = vmov 0   ;;  %v869_v1 = vld [vmem:[#allocation5 + $0x4] ss:$16 sps:$4 sm:$0xff]   ;;  %v917_v34 = vld [vmem:[#allocation2] sm:$0xff]  }
  0x38   :  { %317 = vmatprep.mubr.bf16.mxu0 %v1051_v0  ;;  %360 = vmatprep.mubr.bf16.mxu1 %v1051_v0  ;;  %v871_v2 = vld [vmem:[#allocation5 + $0xc] ss:$16 sps:$4 sm:$0xff]   ;;  %v873_v3 = vld [vmem:[#allocation5] ss:$16 sps:$4 sm:$0xff]   ;;  %v874_v4 = vld [vmem:[#allocation5 + $0x8] ss:$16 sps:$4 sm:$0xff]  }
  0x39   :  { %285 = vmatprep.subr.bf16.mxu0 %v869_v1  ;;  %328 = vmatprep.subr.bf16.mxu1 %v871_v2  ;;  %v875_v5 = vld [vmem:[#allocation5 + $0x24] ss:$16 sps:$4 sm:$0xff]   ;;  %v877_v6 = vld [vmem:[#allocation5 + $0x2c] ss:$16 sps:$4 sm:$0xff]   ;;  %v879_v7 = vld [vmem:[#allocation5 + $0x20] ss:$16 sps:$4 sm:$0xff]   ;;  %v99_v2 = vlaneseq }
  0x3a   :  { %286 = vmatpush1.bf16.msra.mxu0 %v873_v3  ;;  %329 = vmatpush1.bf16.msra.mxu1 %v874_v4  ;;  %v880_v8 = vld [vmem:[#allocation5 + $0x28] ss:$16 sps:$4 sm:$0xff]   ;;  %v881_v9 = vld [vmem:[#allocation5 + $0x44] ss:$16 sps:$4 sm:$0xff]   ;;  %v883_v10 = vld [vmem:[#allocation5 + $0x4c] ss:$16 sps:$4 sm:$0xff]  }
  0x3b   :  { %287 = vmatprep.subr.bf16.mxu0 %v875_v5  ;;  %330 = vmatprep.subr.bf16.mxu1 %v877_v6  ;;  %v885_v11 = vld [vmem:[#allocation5 + $0x40] ss:$16 sps:$4 sm:$0xff]   ;;  %v886_v12 = vld [vmem:[#allocation5 + $0x48] ss:$16 sps:$4 sm:$0xff]   ;;  %v887_v13 = vld [vmem:[#allocation5 + $0x64] ss:$16 sps:$4 sm:$0xff]  }
  0x3c   :  { %v889_v14 = vld [vmem:[#allocation5 + $0x6c] ss:$16 sps:$4 sm:$0xff]   ;;  %v891_v15 = vld [vmem:[#allocation5 + $0x60] ss:$16 sps:$4 sm:$0xff]   ;;  %v892_v16 = vld [vmem:[#allocation5 + $0x68] ss:$16 sps:$4 sm:$0xff]  }
  0x3d   :  { %v893_v17 = vld [vmem:[#allocation5 + $0x84] ss:$16 sps:$4 sm:$0xff]   ;;  %v895_v18 = vld [vmem:[#allocation5 + $0x8c] ss:$16 sps:$4 sm:$0xff]   ;;  %v897_v19 = vld [vmem:[#allocation5 + $0x80] ss:$16 sps:$4 sm:$0xff]  }
  0x3e   :  { %288 = vmatpush1.bf16.msra.mxu0 %v879_v7  ;;  %331 = vmatpush1.bf16.msra.mxu1 %v880_v8  ;;  %v898_v20 = vld [vmem:[#allocation5 + $0x88] ss:$16 sps:$4 sm:$0xff]   ;;  %v899_v21 = vld [vmem:[#allocation5 + $0xa4] ss:$16 sps:$4 sm:$0xff]   ;;  %v901_v22 = vld [vmem:[#allocation5 + $0xac] ss:$16 sps:$4 sm:$0xff]  }
  0x3f   :  { %289 = vmatprep.subr.bf16.mxu0 %v881_v9  ;;  %332 = vmatprep.subr.bf16.mxu1 %v883_v10  ;;  %v903_v23 = vld [vmem:[#allocation5 + $0xa0] ss:$16 sps:$4 sm:$0xff]   ;;  %v904_v24 = vld [vmem:[#allocation5 + $0xa8] ss:$16 sps:$4 sm:$0xff]   ;;  %v905_v25 = vld [vmem:[#allocation5 + $0xc4] ss:$16 sps:$4 sm:$0xff]  }
  0x40   :  { %v907_v26 = vld [vmem:[#allocation5 + $0xcc] ss:$16 sps:$4 sm:$0xff]   ;;  %v909_v27 = vld [vmem:[#allocation5 + $0xc0] ss:$16 sps:$4 sm:$0xff]   ;;  %v910_v28 = vld [vmem:[#allocation5 + $0xc8] ss:$16 sps:$4 sm:$0xff]  }
  0x41   :  { %v911_v29 = vld [vmem:[#allocation5 + $0xe4] ss:$16 sps:$4 sm:$0xff]   ;;  %v913_v30 = vld [vmem:[#allocation5 + $0xec] ss:$16 sps:$4 sm:$0xff]   ;;  %v915_v31 = vld [vmem:[#allocation5 + $0xe0] ss:$16 sps:$4 sm:$0xff]  }
  0x42   :  { %290 = vmatpush1.bf16.msra.mxu0 %v885_v11  ;;  %333 = vmatpush1.bf16.msra.mxu1 %v886_v12  ;;  %v916_v32 = vld [vmem:[#allocation5 + $0xe8] ss:$16 sps:$4 sm:$0xff]   ;;  %v918_v33 = vld [vmem:[#allocation7 + $0x40] sm:$0xff]   ;;  %v926_v42 = vld [vmem:[#allocation7 + $0x50] sm:$0xff]   ;;  %v100_v3 = vshrl.u32 %v99_v2, 7  ;;  %s1052_s8 = smov [#allocation8]  }
  0x43   :  { %291 = vmatprep.subr.bf16.mxu0 %v887_v13  ;;  %334 = vmatprep.subr.bf16.mxu1 %v889_v14  ;;  %v919_v35 = vld [vmem:[#allocation7 + $0xc0] sm:$0xff]   ;;  %v922_v38 = vld [vmem:[#allocation7 + $0x48] sm:$0xff]   ;;  %v927_v43 = vld [vmem:[#allocation7 + $0xd0] sm:$0xff]   ;;  %s735_s9 = sshll.u32 %s1052_s8, 4  ;;  %s736_s9 = int_to_ptr.vmem [resolvable:$true] %s735_s9 }
  0x44   :  { %v920_v36 = vld [vmem:[#allocation7] sm:$0xff]   ;;  %v923_v39 = vld [vmem:[#allocation7 + $0xc8] sm:$0xff]   ;;  %v928_v44 = vld [vmem:[#allocation7 + $0x10] sm:$0xff]   ;;  %v101_v4 = vsub.s32 0, %v100_v3  ;;  %v109_v5 = vsub.s32 2, %v100_v3  ;;  %v105_v7 = vsub.s32 1, %v100_v3  ;;  %p1021_p11 = scmp.lt.s32.totalorder %s736_s9, %s736_s9 }
  0x45   :  { %v921_v37 = vld [vmem:[#allocation7 + $0x80] sm:$0xff]   ;;  %v924_v40 = vld [vmem:[#allocation7 + $0x8] sm:$0xff]   ;;  %v929_v45 = vld [vmem:[#allocation7 + $0x90] sm:$0xff]   ;;  %v113_v8 = vsub.s32 3, %v100_v3 }
  0x46   :  { %292 = vmatpush1.bf16.msra.mxu0 %v891_v15  ;;  %335 = vmatpush1.bf16.msra.mxu1 %v892_v16  ;;  %v925_v41 = vld [vmem:[#allocation7 + $0x88] sm:$0xff]   ;;  %v930_v46 = vld [vmem:[#allocation7 + $0x58] sm:$0xff]   ;;  %v934_v50 = vld [vmem:[#allocation7 + $0x60] sm:$0xff]  }
  0x47   :  { %293 = vmatprep.subr.bf16.mxu0 %v893_v17  ;;  %336 = vmatprep.subr.bf16.mxu1 %v895_v18  ;;  %v931_v47 = vld [vmem:[#allocation7 + $0xd8] sm:$0xff]   ;;  %v935_v51 = vld [vmem:[#allocation7 + $0xe0] sm:$0xff]   ;;  %v938_v54 = vld [vmem:[#allocation7 + $0x68] sm:$0xff]  }
  0x48   :  { %v932_v48 = vld [vmem:[#allocation7 + $0x18] sm:$0xff]   ;;  %v936_v52 = vld [vmem:[#allocation7 + $0x20] sm:$0xff]   ;;  %v939_v55 = vld [vmem:[#allocation7 + $0xe8] sm:$0xff]  }
  0x49   :  { %v933_v49 = vld [vmem:[#allocation7 + $0x98] sm:$0xff]   ;;  %v937_v53 = vld [vmem:[#allocation7 + $0xa0] sm:$0xff]   ;;  %v940_v56 = vld [vmem:[#allocation7 + $0x28] sm:$0xff]  }
  0x4a   :  { %294 = vmatpush1.bf16.msra.mxu0 %v897_v19  ;;  %337 = vmatpush1.bf16.msra.mxu1 %v898_v20  ;;  %v941_v57 = vld [vmem:[#allocation7 + $0xa8] sm:$0xff]   ;;  %v942_v58 = vld [vmem:[#allocation7 + $0x70] sm:$0xff]   ;;  %v946_v62 = vld [vmem:[#allocation7 + $0x78] sm:$0xff]  }
  0x4b   :  { %295 = vmatprep.subr.bf16.mxu0 %v899_v21  ;;  %338 = vmatprep.subr.bf16.mxu1 %v901_v22  ;;  %v943_v59 = vld [vmem:[#allocation7 + $0xf0] sm:$0xff]   ;;  %v947_v63 = vld [vmem:[#allocation7 + $0xf8] sm:$0xff]  }
  0x4c   :  { %v944_v60 = vld [vmem:[#allocation7 + $0x30] sm:$0xff]   ;;  %v948_v0 = vld [vmem:[#allocation7 + $0x38] sm:$0xff]  }
  0x4d   :  { %v945_v61 = vld [vmem:[#allocation7 + $0xb0] sm:$0xff]   ;;  %v949_v1 = vld [vmem:[#allocation7 + $0xb8] sm:$0xff]  }
  0x4e   :  { %296 = vmatpush1.bf16.msra.mxu0 %v903_v23  ;;  %339 = vmatpush1.bf16.msra.mxu1 %v904_v24  ;;  %v97_v6 = vld [vmem:[%s1141_s2] sm:$0xf] }
  0x4f   :  { %297 = vmatprep.subr.bf16.mxu0 %v905_v25  ;;  %340 = vmatprep.subr.bf16.mxu1 %v907_v26  ;;  %v102_v9 = vrot.slane %v97_v6, %v101_v4  ;;  %v110_v10 = vrot.slane %v97_v6, %v109_v5  ;;  %v106_v11 = vrot.slane %v97_v6, %v105_v7 }
  0x50   :  { %v114_v12 = vrot.slane %v97_v6, %v113_v8 }
  0x52   :  { %298 = vmatpush1.bf16.msra.mxu0 %v909_v27  ;;  %341 = vmatpush1.bf16.msra.mxu1 %v910_v28 }
  0x53   :  { %299 = vmatprep.subr.bf16.mxu0 %v911_v29  ;;  %342 = vmatprep.subr.bf16.mxu1 %v913_v30 }
  0x56   :  { %300 = vmatpush1.bf16.msra.mxu0 %v915_v31  ;;  %343 = vmatpush1.bf16.msra.mxu1 %v916_v32 }
  0x57   :  { %814 = vmatprep.subr.bf16.mxu0 %v918_v33  ;;  %836 = vmatprep.subr.bf16.mxu1 %v919_v35 }
  0x59   :  { %318 = vmatmul.mubr.bf16.vlgmr.msra.gmra.mrb[0].mxu0 %v917_v34  ;;  %361 = vmatmul.mubr.bf16.vlgmr.msra.gmra.mrb[0].mxu1 %v917_v34 }
  0x5a   :  { %815 = vmatpush3.bf16.msra.mxu0 %v920_v36  ;;  %837 = vmatpush3.bf16.msra.mxu1 %v921_v37 }
  0x5b   :  { %816 = vmatprep.subr.bf16.mxu0 %v922_v38  ;;  %838 = vmatprep.subr.bf16.mxu1 %v923_v39 }
  0x5e   :  { %817 = vmatpush3.bf16.msra.mxu0 %v924_v40  ;;  %839 = vmatpush3.bf16.msra.mxu1 %v925_v41 }
  0x5f   :  { %818 = vmatprep.subr.bf16.mxu0 %v926_v42  ;;  %840 = vmatprep.subr.bf16.mxu1 %v927_v43  ;;  %v781_v43 = vld [vmem:[%s1143_s4] ss:$0 sm:$0xff]  ;;  %s1016_s4 = scalar_lea.vmem %s736_s9, 256 }
  0x60   :  { %p1017_p10 = scmp.ne.s32.totalorder %s736_s9, %s1016_s4  ;;  %p1022_p12 = scmp.lt.s32.totalorder %s1016_s4, %s1016_s4 }
  0x62   :  { %819 = vmatpush3.bf16.msra.mxu0 %v928_v44  ;;  %841 = vmatpush3.bf16.msra.mxu1 %v929_v45  ;;  %p1023_p13 = por %p1022_p12, %p1021_p11 }
  0x63   :  { %820 = vmatprep.subr.bf16.mxu0 %v930_v46  ;;  %842 = vmatprep.subr.bf16.mxu1 %v931_v47 }
  0x64   :  { %p1024_p0 = pnand %p1023_p13, %p1017_p10 }
  0x66   :  { %821 = vmatpush3.bf16.msra.mxu0 %v932_v48  ;;  %843 = vmatpush3.bf16.msra.mxu1 %v933_v49 }
  0x67   :  { %822 = vmatprep.subr.bf16.mxu0 %v934_v50  ;;  %844 = vmatprep.subr.bf16.mxu1 %v935_v51 }
  0x6a   :  { %823 = vmatpush3.bf16.msra.mxu0 %v936_v52  ;;  %845 = vmatpush3.bf16.msra.mxu1 %v937_v53 }
  0x6b   :  { %824 = vmatprep.subr.bf16.mxu0 %v938_v54  ;;  %846 = vmatprep.subr.bf16.mxu1 %v939_v55 }
  0x6e   :  { %825 = vmatpush3.bf16.msra.mxu0 %v940_v56  ;;  %847 = vmatpush3.bf16.msra.mxu1 %v941_v57 }
  0x6f   :  { %826 = vmatprep.subr.bf16.mxu0 %v942_v58  ;;  %848 = vmatprep.subr.bf16.mxu1 %v943_v59 }
  0x72   :  { %827 = vmatpush3.bf16.msra.mxu0 %v944_v60  ;;  %849 = vmatpush3.bf16.msra.mxu1 %v945_v61 }
  0x73   :  { %828 = vmatprep.subr.bf16.mxu0 %v946_v62  ;;  %850 = vmatprep.subr.bf16.mxu1 %v947_v63 }
  0x76   :  { %829 = vmatpush3.bf16.msra.mxu0 %v948_v0  ;;  %851 = vmatpush3.bf16.msra.mxu1 %v949_v1 }
 0x12c   :  { %v319_v13 = vpop.f32.mrb[0].mxu0  ;;  %v362_v14 = vpop.f32.mrb[0].mxu1 }
 0x12d   :  { %v320_v15 = vadd.f32 %v319_v13, %v102_v9  ;;  %v363_v16 = vadd.f32 %v362_v14, %v110_v10  ;;  %v321_v17 = vpop.f32.mrb[1].mxu0  ;;  %v364_v18 = vpop.f32.mrb[1].mxu1 }
 0x12e   :  { %v322_v19 = vadd.f32 %v321_v17, %v106_v11  ;;  %v365_v20 = vadd.f32 %v364_v18, %v114_v12  ;;  %v323_v21 = vpop.f32.mrb[2].mxu0  ;;  %v366_v22 = vpop.f32.mrb[2].mxu1 }
 0x12f   :  { %v373_v23 = vmax.f32 %v363_v16, 0.0  ;;  %v324_v24 = vadd.f32 %v323_v21, %v102_v9  ;;  %v367_v25 = vadd.f32 %v366_v22, %v110_v10  ;;  %v325_v26 = vpop.f32.mrb[3].mxu0  ;;  %v368_v27 = vpop.f32.mrb[3].mxu1  ;;  %v371_v31 = vmax.f32 %v320_v15, 0.0 }
 0x130   :  { %v374_v28 = vmax.f32 %v365_v20, 0.0  ;;  %v326_v29 = vadd.f32 %v325_v26, %v106_v11  ;;  %v369_v30 = vadd.f32 %v368_v27, %v114_v12  ;;  %v372_v34 = vmax.f32 %v322_v19, 0.0 }
 0x131   :  { %v375_v32 = vmax.f32 %v324_v24, 0.0  ;;  %v377_v33 = vmax.f32 %v367_v25, 0.0 }
 0x132   :  { %v376_v35 = vmax.f32 %v326_v29, 0.0  ;;  %v378_v36 = vmax.f32 %v369_v30, 0.0 }
 0x133   :  { %v379_v37 = vpack.c.bf16 %v375_v32, %v371_v31  ;;  %v381_v38 = vpack.c.bf16 %v377_v33, %v373_v23 }
 0x134   :  { %v380_v39 = vpack.c.bf16 %v376_v35, %v372_v34  ;;  %v382_v40 = vpack.c.bf16 %v378_v36, %v374_v28 }
 0x136   :  { %678 = vmatprep.mubr.bf16.mxu0 %v380_v39  ;;  %719 = vmatprep.mubr.bf16.mxu1 %v382_v40 }
 0x137   :  { %679 = vmatmul.mubr.bf16.vlgmr.msra.gmra.mrb[4].mxu0 %v379_v37  ;;  %720 = vmatmul.mubr.bf16.vlgmr.msra.gmra.mrb[4].mxu1 %v381_v38 }
 0x20a   :  { %v830_v41 = vpop.f32.mrb[4].mxu0  ;;  %v852_v42 = vpop.f32.mrb[4].mxu1 }
 0x20b   :  { %v831_v44 = vpop.f32.mrb[5].mxu0  ;;  %v853_v45 = vpop.f32.mrb[5].mxu1 }
 0x20c   :  { %v832_v46 = vadd.f32 %v831_v44, %v830_v41  ;;  %v854_v47 = vadd.f32 %v853_v45, %v852_v42  ;;  %v833_v48 = vpop.f32.mrb[6].mxu0  ;;  %v855_v49 = vpop.f32.mrb[6].mxu1 }
 0x20d   :  { %v834_v50 = vpop.f32.mrb[7].mxu0  ;;  %v856_v51 = vpop.f32.mrb[7].mxu1 }
 0x20e   :  { %v681_v52 = vadd.f32 %v832_v46, %v781_v43  ;;  %v835_v53 = vadd.f32 %v834_v50, %v833_v48  ;;  %v857_v54 = vadd.f32 %v856_v51, %v855_v49 }
 0x210   :  { %v722_v55 = vadd.f32 %v854_v47, %v681_v52  ;;  %v684_v56 = vadd.f32 %v835_v53, %v781_v43 }
 0x212   :  { %728 = vst [vmem:[#allocation8] sm:$0xff] %v722_v55  ;;  %v725_v57 = vadd.f32 %v857_v54, %v684_v56 }
 0x214   :  { %729 = vst [vmem:[#allocation8 + $0x8] sm:$0xff] %v725_v57 }
 0x215   :  { %1027 = shalt.err (!%p1024_p0)
}
 0x216   :  { %s1028_s12 = scalar_lea.hbm %s1144_s5, 256 }
 0x217   :  { %p1029_p1 = scmp.ne.s32.totalorder %s1144_s5, %s1028_s12  ;;  %p1032_p2 = scmp.lt.u32.totalorder %s1028_s12, %s1144_s5 }
 0x219   :  { %p1034_p3 = pnand %p1032_p2, %p1029_p1 }
 0x21b   :  { %1037 = shalt.err (!%p1034_p3)
}
 0x21c   :  { %s1053_s1 = smov 128   ;;  %s1054_s17 = smov 8  }
 0x21d   :  { %741 = dma.vmem_to_hbm [thread:$0]  %s736_s9, 256, %s1144_s5, [#allocation4], %s1053_s1, %s1053_s1, %s1054_s17  }
 0x21e   :  { %1042 = dma.done.wait [#allocation4], 256  }
 0x21f   :  { %1043 = vsyncadd [#allocation4], 4294967040 }
 0x220   :  { %745 = vsyncpa [#allocation3], 1 }
 0x221   :  { %746 = vsyncpa [#allocation6], 1 }
 0x222   :  { %747 = vsyncpa [#allocation4], 1 }

</bundles_post_ra>
